<compile_context>
chip_gen: v7x
topology: tpu7x:2x2x1
jax: 0.10.0
libtpu: 0.0.40
codegen_flags: <defaults>
</compile_context>

<pallas_src>
import functools

import jax
import jax.numpy as jnp
from jax import lax
from jax.experimental import pallas as pl
from jax.experimental.pallas import tpu as pltpu


_TL_OUT = 128                       # lane-dense output tile (multiple of 128)
_TR_MAX = 2048                      # max row tile
_FOLD_ROW_THRESHOLD = 256           # fold length blocks into rows below this many rows
_VMEM_BUDGET = 20 * 1024 * 1024     # budget for pipelined blocks (under the 32 MiB scoped limit)
_VMEM_LIMIT = 32 * 1024 * 1024


def _pick_row_tile(rows, cols_per_row, p_bytes, itemsize):
    """Largest row tile (multiple of 8, <= _TR_MAX) whose double-buffered blocks fit the budget."""
    per_row = 2 * cols_per_row * itemsize           # in + out columns, double-buffered
    cap = (_VMEM_BUDGET - 2 * p_bytes) // max(per_row, 1)
    cap = max(8, min(_TR_MAX, int(cap)))
    cap = max(8, (cap // 8) * 8)
    return rows if rows <= cap else cap


def _compiler_params():
    # Both grid axes write disjoint output blocks -> both can be megacore-sharded on v7x.
    return pltpu.CompilerParams(
        dimension_semantics=("parallel", "parallel"),
        vmem_limit_bytes=_VMEM_LIMIT,
    )


def _pool_matrices(tl, tl_out, pool_size, strides, dtype, with_halo):
    """0/1 pooling matrices: p0 for the current input block, p1 for the next-block halo."""
    ii = jnp.arange(tl)[:, None]
    jj = jnp.arange(tl_out)[None, :]
    start = jj * strides
    p0 = ((ii >= start) & (ii < start + pool_size)).astype(dtype)
    if not with_halo:
        return p0, None
    p1 = (((ii + tl) >= start) & ((ii + tl) < start + pool_size)).astype(dtype)
    return p0, p1


def _pool_kernel(x_ref, p_ref, o_ref, *, inv_pool, tl, length, mask_tail, lhs_dtype):
    # x_ref: (TR, TL)   p_ref: (TL, TL_OUT)   o_ref: (TR, TL_OUT)
    x = x_ref[...]
    if mask_tail:
        # Only the last length block can contain padded (undefined) VMEM columns; zero them so
        # NaN/Inf garbage cannot propagate through 0-weight MXU columns. (1, TL) iota + compare
        # keeps the extra VPU work to a single broadcast select per block.
        k = pl.program_id(1)
        col = k * tl + lax.broadcasted_iota(jnp.int32, (1, tl), 1)
        x = jnp.where(col < length, x, jnp.zeros_like(x))
    if lhs_dtype is not None:
        x = x.astype(lhs_dtype)
    acc = jnp.dot(x, p_ref[...], preferred_element_type=jnp.float32)
    o_ref[...] = (acc * inv_pool).astype(o_ref.dtype)


def _pool_halo_kernel(xa_ref, xb_ref, p0_ref, p1_ref, o_ref, *,
                      inv_pool, tl, length, n_in, mask_tail, lhs_dtype):
    # Overlapping windows: output block k = xa(block k) @ p0 + xb(block k+1, clamped) @ p1.
    xa = xa_ref[...]
    xb = xb_ref[...]
    if mask_tail:
        k = pl.program_id(1)
        kb = jnp.minimum(k + 1, n_in - 1)
        col = lax.broadcasted_iota(jnp.int32, (1, tl), 1)
        xa = jnp.where(k * tl + col < length, xa, jnp.zeros_like(xa))
        xb = jnp.where(kb * tl + col < length, xb, jnp.zeros_like(xb))
    if lhs_dtype is not None:
        xa = xa.astype(lhs_dtype)
        xb = xb.astype(lhs_dtype)
    acc = jnp.dot(xa, p0_ref[...], preferred_element_type=jnp.float32)
    acc = acc + jnp.dot(xb, p1_ref[...], preferred_element_type=jnp.float32)
    o_ref[...] = (acc * inv_pool).astype(o_ref.dtype)


def _single_call(x2d, p, *, tl, tl_out, length, l_out, inv_pool, mask_tail, out_dtype, lhs_dtype):
    rows = x2d.shape[0]
    itemsize = jnp.dtype(x2d.dtype).itemsize
    p_bytes = int(p.size) * jnp.dtype(p.dtype).itemsize
    tr = _pick_row_tile(rows, tl + tl_out, p_bytes, itemsize)
    n_row = pl.cdiv(rows, tr)
    n_len = pl.cdiv(l_out, tl_out)

    kernel = functools.partial(
        _pool_kernel, inv_pool=inv_pool, tl=tl, length=length,
        mask_tail=mask_tail, lhs_dtype=lhs_dtype)

    cost = pl.CostEstimate(
        flops=2 * rows * n_len * tl * tl_out,
        transcendentals=0,
        bytes_accessed=(rows * length + rows * l_out) * itemsize + p_bytes)

    return pl.pallas_call(
        kernel,
        out_shape=jax.ShapeDtypeStruct((rows, l_out), out_dtype),
        grid_spec=pl.GridSpec(
            grid=(n_row, n_len),
            in_specs=[
                pl.BlockSpec((tr, tl), lambda i, k: (i, k)),
                # The pooling-matrix block index never changes, so it is effectively resident
                # (Pallas only re-DMAs on a block-index change). Single-buffering it
                # (pl.Buffered(1)) was considered but is unnecessary at ~128 KiB.
                pl.BlockSpec((tl, tl_out), lambda i, k: (0, 0)),
            ],
            out_specs=pl.BlockSpec((tr, tl_out), lambda i, k: (i, k)),
        ),
        compiler_params=_compiler_params(),
        cost_estimate=cost,
    )(x2d, p)


def _halo_call(x2d, p0, p1, *, tl, tl_out, length, l_out, inv_pool, out_dtype, lhs_dtype):
    rows = x2d.shape[0]
    itemsize = jnp.dtype(x2d.dtype).itemsize
    p_bytes = (int(p0.size) + int(p1.size)) * jnp.dtype(p0.dtype).itemsize
    tr = _pick_row_tile(rows, 2 * tl + tl_out, p_bytes, itemsize)
    n_row = pl.cdiv(rows, tr)
    n_len = pl.cdiv(l_out, tl_out)
    n_in = pl.cdiv(length, tl)
    mask_tail = n_in * tl > length

    kernel = functools.partial(
        _pool_halo_kernel, inv_pool=inv_pool, tl=tl, length=length,
        n_in=n_in, mask_tail=mask_tail, lhs_dtype=lhs_dtype)

    cost = pl.CostEstimate(
        flops=4 * rows * n_len * tl * tl_out,
        transcendentals=0,
        bytes_accessed=(2 * rows * length + rows * l_out) * itemsize + p_bytes)

    return pl.pallas_call(
        kernel,
        out_shape=jax.ShapeDtypeStruct((rows, l_out), out_dtype),
        grid_spec=pl.GridSpec(
            grid=(n_row, n_len),
            in_specs=[
                pl.BlockSpec((tr, tl), lambda i, k: (i, k)),
                pl.BlockSpec((tr, tl), lambda i, k: (i, jnp.minimum(k + 1, n_in - 1))),
                pl.BlockSpec((tl, tl_out), lambda i, k: (0, 0)),
                pl.BlockSpec((tl, tl_out), lambda i, k: (0, 0)),
            ],
            out_specs=pl.BlockSpec((tr, tl_out), lambda i, k: (i, k)),
        ),
        compiler_params=_compiler_params(),
        cost_estimate=cost,
    )(x2d, x2d, p0, p1)


def avg_pool(x, pool_size=2, strides=2, *, matmul_dtype=None):
    """1D average pooling, semantics of torch.nn.AvgPool1d(pool_size, stride=strides).

    x: (batch, channels, length) -> (batch, channels, (length - pool_size) // strides + 1)

    matmul_dtype: optional narrower MXU operand dtype (e.g. jnp.bfloat16 on v5e); accumulation
    and the 1/pool_size scale stay in f32.
    """
    b, c, length = x.shape
    dtype = x.dtype
    l_out = (length - pool_size) // strides + 1
    if l_out < 1:
        raise ValueError("pool_size larger than input length")
    rows = b * c
    x2d = x.reshape(rows, length)
    inv_pool = 1.0 / float(pool_size)
    lhs_dtype = None if matmul_dtype is None else jnp.dtype(matmul_dtype)
    p_dtype = jnp.dtype(dtype) if matmul_dtype is None else jnp.dtype(matmul_dtype)

    overlap = pool_size > strides
    tl_out = _TL_OUT
    tl = tl_out * strides

    if l_out <= tl_out or (overlap and pool_size > tl + strides):
        # Small output (or pathological pool_size spanning >2 blocks): one dense length block.
        # TODO(synk): round tl_out up to a multiple of 128 (zero-padded p columns) for unmasked
        # stores on mid-size l_out, and length-tile truly huge dense blocks.
        p, _ = _pool_matrices(length, l_out, pool_size, strides, p_dtype, with_halo=False)
        out2d = _single_call(
            x2d, p, tl=length, tl_out=l_out, length=length, l_out=l_out,
            inv_pool=inv_pool, mask_tail=False, out_dtype=dtype, lhs_dtype=lhs_dtype)
    elif not overlap:
        # Non-overlapping windows: block-diagonal pooling; every TL-wide input block reuses the
        # same small (TL, TL_OUT) pooling matrix.
        p, _ = _pool_matrices(tl, tl_out, pool_size, strides, p_dtype, with_halo=False)
        n_len = pl.cdiv(l_out, tl_out)
        if rows < _FOLD_ROW_THRESHOLD:
            # Skinny-row fold: zero-pad the length axis once, then view length blocks as extra
            # rows (free row-major reshape) -> big MXU M-dim, fat parallel row axis, no tail mask.
            padded = n_len * tl
            if padded != length:
                x2d = jnp.pad(x2d, ((0, 0), (0, padded - length)))
            xf = x2d.reshape(rows * n_len, tl)
            outf = _single_call(
                xf, p, tl=tl, tl_out=tl_out, length=tl, l_out=tl_out,
                inv_pool=inv_pool, mask_tail=False, out_dtype=dtype, lhs_dtype=lhs_dtype)
            out2d = outf.reshape(rows, n_len * tl_out)[:, :l_out]
        else:
            mask_tail = n_len * tl > length
            out2d = _single_call(
                x2d, p, tl=tl, tl_out=tl_out, length=length, l_out=l_out,
                inv_pool=inv_pool, mask_tail=mask_tail, out_dtype=dtype, lhs_dtype=lhs_dtype)
    else:
        # Overlapping windows (pool_size > strides): halo tiling. Each output block needs its
        # TL-wide input block plus a (pool_size - strides)-wide halo from the next block, so it
        # is two block-diagonal matmuls with bounded VMEM.
        p0, p1 = _pool_matrices(tl, tl_out, pool_size, strides, p_dtype, with_halo=True)
        out2d = _halo_call(
            x2d, p0, p1, tl=tl, tl_out=tl_out, length=length, l_out=l_out,
            inv_pool=inv_pool, out_dtype=dtype, lhs_dtype=lhs_dtype)

    return out2d.reshape(b, c, l_out)


if __name__ == "__main__":
    def ref_avg_pool(x, pool_size, strides):
        _, _, L = x.shape
        lo = (L - pool_size) // strides + 1
        idx = jnp.arange(lo)[:, None] * strides + jnp.arange(pool_size)[None, :]
        return x[..., idx].mean(axis=-1)

    # 1) Small shape consistent with the module: (batch=2, channels=4, length=16), defaults.
    x1 = jax.random.normal(jax.random.PRNGKey(0), (2, 4, 16), dtype=jnp.float32)
    out1 = jax.block_until_ready(avg_pool(x1, pool_size=2, strides=2))
    ref1 = ref_avg_pool(x1, 2, 2)
    assert out1.shape == ref1.shape, (out1.shape, ref1.shape)
    assert jnp.allclose(out1, ref1, atol=1e-6, rtol=1e-6), float(jnp.max(jnp.abs(out1 - ref1)))

    # 2) Skinny-row folded block-diagonal path (rows < 256, l_out > 128, padded length tail).
    x2 = jax.random.normal(jax.random.PRNGKey(1), (2, 4, 1200), dtype=jnp.float32)
    out2 = jax.block_until_ready(avg_pool(x2, pool_size=2, strides=2))
    ref2 = ref_avg_pool(x2, 2, 2)
    assert out2.shape == ref2.shape, (out2.shape, ref2.shape)
    assert jnp.allclose(out2, ref2, atol=1e-5, rtol=1e-5), float(jnp.max(jnp.abs(out2 - ref2)))

    # 3) Wide-row tiled path with in-kernel tail mask (rows >= 256, length not a tile multiple).
    x3 = jax.random.normal(jax.random.PRNGKey(2), (2, 160, 1200), dtype=jnp.float32)
    out3 = jax.block_until_ready(avg_pool(x3, pool_size=2, strides=2))
    ref3 = ref_avg_pool(x3, 2, 2)
    assert out3.shape == ref3.shape, (out3.shape, ref3.shape)
    assert jnp.allclose(out3, ref3, atol=1e-5, rtol=1e-5), float(jnp.max(jnp.abs(out3 - ref3)))

    # 4) Overlapping windows (pool_size > strides): halo-tiled path.
    x4 = jax.random.normal(jax.random.PRNGKey(3), (2, 4, 400), dtype=jnp.float32)
    out4 = jax.block_until_ready(avg_pool(x4, pool_size=3, strides=2))
    ref4 = ref_avg_pool(x4, 3, 2)
    assert out4.shape == ref4.shape, (out4.shape, ref4.shape)
    assert jnp.allclose(out4, ref4, atol=1e-5, rtol=1e-5), float(jnp.max(jnp.abs(out4 - ref4)))

    # 5) Overlapping windows, small dense path.
    x5 = jax.random.normal(jax.random.PRNGKey(4), (2, 4, 32), dtype=jnp.float32)
    out5 = jax.block_until_ready(avg_pool(x5, pool_size=3, strides=1))
    ref5 = ref_avg_pool(x5, 3, 1)
    assert out5.shape == ref5.shape, (out5.shape, ref5.shape)
    assert jnp.allclose(out5, ref5, atol=1e-6, rtol=1e-6), float(jnp.max(jnp.abs(out5 - ref5)))

    print("KERNEL_OK")
</pallas_src>

<mosaic_0001>
module attributes {stable_mosaic.version = 11 : i64} {
  func.func @_pool_kernel(%arg0: i32, %arg1: i32, %arg2: memref<8x16xf32, #tpu.memory_space<vmem>>, %arg3: memref<16x8xf32, #tpu.memory_space<vmem>>, %arg4: memref<8x8xf32, #tpu.memory_space<vmem>>) attributes {dimension_semantics = [#tpu.dimension_semantics<parallel>, #tpu.dimension_semantics<parallel>], iteration_bounds = array<i64: 1, 1>, scalar_prefetch = 0 : i64, scratch_operands = 0 : i64, tpu.core_type = #tpu.core_type<tc>, window_params = [{transform_indices = @transform_0, window_bounds = array<i64: 8, 16>}, {pipeline_mode = #tpu.pipeline_mode<synchronous>, transform_indices = @transform_1, window_bounds = array<i64: 16, 8>}, {transform_indices = @transform_2, window_bounds = array<i64: 8, 8>}]} {
    %c0 = arith.constant 0 : index
    %c0_0 = arith.constant 0 : index
    %0 = vector.load %arg2[%c0, %c0_0] : memref<8x16xf32, #tpu.memory_space<vmem>>, vector<8x16xf32>
    %c0_1 = arith.constant 0 : index
    %c0_2 = arith.constant 0 : index
    %1 = vector.load %arg3[%c0_1, %c0_2] : memref<16x8xf32, #tpu.memory_space<vmem>>, vector<16x8xf32>
    %cst = arith.constant dense<0.000000e+00> : vector<8x8xf32>
    %2 = tpu.matmul %0, %1, %cst {dimension_numbers = #tpu.dot_dimension_numbers<[1], [0], [0], [1], [0, 0, 1, 1], [], []>} : vector<8x16xf32>, vector<16x8xf32>, vector<8x8xf32> -> vector<8x8xf32>
    %cst_3 = arith.constant 5.000000e-01 : f32
    %3 = vector.broadcast %cst_3 : f32 to vector<8x8xf32>
    %4 = arith.mulf %2, %3 : vector<8x8xf32>
    %c0_4 = arith.constant 0 : index
    %c0_5 = arith.constant 0 : index
    %5 = vector.load %arg4[%c0_4, %c0_5] : memref<8x8xf32, #tpu.memory_space<vmem>>, vector<8x8xf32>
    tpu.vector_store %arg4[%c0_4, %c0_5], %4 {strides = array<i32>} : memref<8x8xf32, #tpu.memory_space<vmem>>, vector<8x8xf32>,
    return
  }
  func.func @transform_0(%arg0: i32, %arg1: i32) -> (i32, i32) {
    %c0_i32 = arith.constant 0 : i32
    return %arg0, %arg1 : i32, i32
  }
  func.func @transform_1(%arg0: i32, %arg1: i32) -> (i32, i32) {
    %c0_i32 = arith.constant 0 : i32
    %c0_i32_0 = arith.constant 0 : i32
    %c0_i32_1 = arith.constant 0 : i32
    return %c0_i32, %c0_i32_0 : i32, i32
  }
  func.func @transform_2(%arg0: i32, %arg1: i32) -> (i32, i32) {
    %c0_i32 = arith.constant 0 : i32
    return %arg0, %arg1 : i32, i32
  }
}

</mosaic_0001>

<bundles_post_ra>
// kernel: tpu_custom_call.1
= control target key start
LH: loop header
LB: loop body
LE: loop exit
PB: predicated region body
PF: predicated region fallthrough
CT: control target
= control target key end

     0   :  { %v148_v2 = vmov 0.0|0.0   ;;  %vm149_vm0 = vmmov 0   ;;  %v150_v4 = vmov 0.0   ;;  %s188_s0 = inlined_call_operand.vmem [shape: f32[8,16], index: 0, kind: input, shape index: {}]   ;;  %s189_s1 = inlined_call_operand.vmem [shape: f32[16,8], index: 1, kind: input, shape index: {}]   ;;  %s190_s2 = inlined_call_operand.hbm [shape: f32[8,8], index: 2, kind: output, shape index: {}]  }
   0x1   :  { %v13_v0 = vld [vmem:[%s189_s1] sm:$0xff]  ;;  %v14_v1 = vld [vmem:[%s189_s1 + $0x8] sm:$0xff]  ;;  %117 = vmatprep.subr.bf16.mxu0 %v148_v2  ;;  %114 = vmatprep.mubr.msk.f32.mxu0 %vm149_vm0, %v150_v4 }
   0x2   :  { %v118_v3 = vpack.c.bf16 %v14_v1, %v13_v0 }
   0x3   :  { %7 = vsyncpa [#allocation3], 0  ;;  %v12_v5 = vld [vmem:[%s188_s0] sm:$0xff]  ;;  %vm15_vm1 = vcmask 130048   ;;  %s151_s15 = smov [#allocation2]   ;;  %vm90_vm2 = vcmask 64512  }
   0x4   :  { %119 = vmatpush3.bf16.msra.mxu0 %v118_v3  ;;  %s98_s16 = sshll.u32 %s151_s15, 4  ;;  %s99_s16 = int_to_ptr.vmem [resolvable:$true] %s98_s16 }
   0x5   :  { %s124_s1 = scalar_lea.vmem %s99_s16, 128  ;;  %p129_p1 = scmp.lt.s32.totalorder %s99_s16, %s99_s16 }
   0x6   :  { %p125_p0 = scmp.ne.s32.totalorder %s99_s16, %s124_s1  ;;  %p130_p2 = scmp.lt.s32.totalorder %s124_s1, %s124_s1 }
   0x7   :  { %115 = vmatmul.mubr.msk.f32.vlgmr.msra.gmra.mrb[0].mxu0 %vm15_vm1, %v12_v5 }
   0x8   :  { %p131_p3 = por %p130_p2, %p129_p1 }
   0xa   :  { %p132_p4 = pnand %p131_p3, %p125_p0 }
  0xda   :  { %v85_v6 = vpop.f32.mrb[0].mxu0 }
  0xdb   :  { %v89_v7 = vmul.f32 0.5, %v85_v6  ;;  %v116_v8 = vpop.f32.mrb[1].mxu0 }
  0xdd   :  { %91 = vst.msk [vmem:[#allocation2] sm:$0xff] %vm90_vm2, %v89_v7 }
  0xde   :  { %135 = shalt.err (!%p132_p4)
}
  0xdf   :  { %s136_s0 = scalar_lea.hbm %s190_s2, 128 }
  0xe0   :  { %p137_p5 = scmp.ne.s32.totalorder %s190_s2, %s136_s0  ;;  %p140_p6 = scmp.lt.u32.totalorder %s136_s0, %s190_s2 }
  0xe2   :  { %p142_p7 = pnand %p140_p6, %p137_p5 }
  0xe4   :  { %145 = shalt.err (!%p142_p7)
}
  0xe5   :  { %101 = dma.vmem_to_hbm [thread:$0]  %s99_s16, 128, %s190_s2, [#allocation3]  }
  0xe6   :  { %146 = dma.done.wait [#allocation3], 128  }
  0xe7   :  { %147 = vsyncadd [#allocation3], 4294967168 }
  0xe8   :  { %105 = vsyncpa [#allocation3], 1 }

</bundles_post_ra>
